<compile_context>
chip_gen: v6e
topology: v6e:2x2x1
jax: 0.10.0
libtpu: 0.0.40
codegen_flags: <defaults>
</compile_context>

<pallas_src>
import math

import jax
import jax.numpy as jnp
from jax.experimental import pallas as pl
from jax.experimental.pallas import tpu as pltpu


def gcn_kernel(x_ref, w2t_ref, w1c_ref, bias_ref, o_ref):
    # x_ref   : (TB*N, D)  packed batch slab, input dtype
    # w2t_ref : (D, D)     W2^T, resident, input dtype
    # w1c_ref : (N, N, 1)  w1c_ref[n, o, 0] = W1[o, n], f32, resident
    # bias_ref: (N, D)     fused bias (b1 folded through W2, plus b2), f32
    # o_ref   : (TB*N, D)  output slab, input dtype
    TBN, D = o_ref.shape
    N = w1c_ref.shape[0]
    TB = TBN // N

    # (1) Dominant matmul: one big weight-stationary MXU pass, f32 accumulation.
    t = jnp.dot(x_ref[...], w2t_ref[...], preferred_element_type=jnp.float32)
    t3 = t.reshape(TB, N, D)          # layout-friendly: each (N, D) block = vregs

    # (2) Tiny N-channel mix, off the MXU (no per-batch weight reloads):
    #     y3[b, o, :] = sum_n W1[o, n] * t3[b, n, :]
    #     Unrolled VPU scaled-adds: sublane-broadcast row n of each batch block
    #     and multiply by the (N, 1) column pattern of W1.
    acc = w1c_ref[0][None, :, :] * t3[:, 0:1, :]
    for n in range(1, N):
        acc = acc + w1c_ref[n][None, :, :] * t3[:, n:n + 1, :]

    # (3) Single fused bias add, then a free reshape back to the lane-dense
    #     2D output slab (plain unmasked vector stores).
    y = acc + bias_ref[...][None, :, :]
    o_ref[...] = y.reshape(TBN, D).astype(o_ref.dtype)


def _vmem_limit_bytes():
    """Explicit VMEM limit: half of physical, capped at 64 MiB (v7x-safe)."""
    try:
        cap = pltpu.get_tpu_info().vmem_capacity_bytes
    except Exception:
        cap = 64 << 20          # conservative (v7x-sized) fallback
    return int(min(cap // 2, 64 << 20))


def _choose_block_batch(B, N, D, in_itemsize, out_itemsize, vmem_limit):
    """Batches per grid step: (a) fit an explicit VMEM budget, (b) divide B
    exactly (avoid a padded HBM copy of x), (c) give >= 2 and preferably an
    even number of grid steps so both v7x TensorCores get work."""
    # Per packed batch element: 2x double-buffered input + 2x output block
    # + ~3 f32 temporaries (matmul result, accumulator, broadcast scratch).
    per_b = N * D * (2 * in_itemsize + 2 * out_itemsize + 3 * 4)
    budget = min(16 << 20, vmem_limit // 2)
    tb_max = max(1, min(int(budget // per_b), B))

    m = 8 // math.gcd(N, 8)     # keep (tb*N) sublane-aligned when tiled
    cands = [d for d in range(1, tb_max + 1)
             if B % d == 0 and (d % m == 0 or d == B)]
    if cands:
        multi = [d for d in cands if B // d >= 2]          # megacore: >= 2 steps
        even = [d for d in multi if (B // d) % 2 == 0]     # ... ideally even
        pool = even or multi or cands
        return max(pool), False
    # Awkward B (no usable divisor): fall back to padding with a big block.
    tb = max(m, (tb_max // m) * m)
    return tb, True


def gcn_forward(x, w1, b1, w2, b2, *, block_batch=None):
    """x: (B, dim1, dim2) -> (B, dim1, dim2); computed in x.dtype, f32 accum."""
    B, N, D = x.shape
    assert w1.shape == (N, N) and w2.shape == (D, D)
    assert b1.shape == (N,) and b2.shape == (D,)

    out_dtype = x.dtype
    cdt = jnp.dtype(x.dtype)   # no wrapper cast of x (would add an HBM pass)
    out_isz = jnp.dtype(out_dtype).itemsize

    # --- wrapper-side layout plumbing (done once, outside the kernel) ---
    w2t = w2.T.astype(cdt)                                   # pre-transposed
    w1cols = w1.T.astype(jnp.float32).reshape(N, N, 1)       # [n, o, 0] = W1[o, n]
    bias = (b1.astype(jnp.float32)[:, None]
            * w2.astype(jnp.float32).sum(axis=1)[None, :]
            + b2.astype(jnp.float32)[None, :])               # fused (N, D) bias

    vmem_limit = _vmem_limit_bytes()
    if block_batch is not None:
        tb = int(block_batch)
        needs_pad = (B % tb) != 0
    else:
        tb, needs_pad = _choose_block_batch(
            B, N, D, cdt.itemsize, out_isz, vmem_limit)
    n_blocks = (B + tb - 1) // tb
    Bp = n_blocks * tb

    xc = x
    if needs_pad:
        # TODO(synk): replace with a clamped/overlapping tail block to avoid a
        # full HBM copy of x for batch sizes with no usable divisor.
        xc = jnp.pad(xc, ((0, Bp - B), (0, 0), (0, 0)))
    x_flat = xc.reshape(Bp * N, D)        # free row-major reshape

    flops = 2 * Bp * N * D * D + 2 * Bp * N * N * D
    bytes_accessed = (Bp * N * D * (cdt.itemsize + out_isz)
                      + D * D * cdt.itemsize + N * D * 4 + N * N * 4)

    out = pl.pallas_call(
        gcn_kernel,
        out_shape=jax.ShapeDtypeStruct((Bp * N, D), out_dtype),
        grid_spec=pltpu.PrefetchScalarGridSpec(
            num_scalar_prefetch=0,
            grid=(n_blocks,),
            in_specs=[
                pl.BlockSpec((tb * N, D), lambda i: (i, 0)),     # packed x slab
                pl.BlockSpec((D, D), lambda i: (0, 0)),          # W2^T (resident)
                pl.BlockSpec((N, N, 1), lambda i: (0, 0, 0)),    # W1 cols (resident)
                pl.BlockSpec((N, D), lambda i: (0, 0)),          # fused bias (resident)
            ],
            out_specs=pl.BlockSpec((tb * N, D), lambda i: (i, 0)),  # lane-dense 2D
        ),
        compiler_params=pltpu.CompilerParams(
            dimension_semantics=("parallel",),
            vmem_limit_bytes=vmem_limit,
        ),
        cost_estimate=pl.CostEstimate(flops=flops, transcendentals=0,
                                      bytes_accessed=bytes_accessed),
    )(x_flat, w2t, w1cols, bias)

    out = out.reshape(Bp, N, D)
    return out[:B] if Bp != B else out


def gcn_reference(x, w1, b1, w2, b2):
    """Pure-JAX reference mirroring the PyTorch forward."""
    h = jnp.einsum("oc,bcd->bod", w1, x) + b1[None, :, None]
    hp = jnp.transpose(h, (0, 2, 1))                              # (B, D, N)
    z = jnp.einsum("oc,bcn->bon", w2, hp) + b2[None, :, None]     # (B, D, N)
    return jnp.transpose(z, (0, 2, 1))                            # (B, N, D)


if __name__ == "__main__":
    B, dim1, dim2 = 2, 8, 128   # (batch, dim_1_channels, dim_2_channels)

    key = jax.random.PRNGKey(0)
    kx, kw1, kb1, kw2, kb2 = jax.random.split(key, 5)

    x = jax.random.normal(kx, (B, dim1, dim2), dtype=jnp.float32)
    w1 = jax.random.normal(kw1, (dim1, dim1), dtype=jnp.float32) * 0.1
    b1 = jax.random.normal(kb1, (dim1,), dtype=jnp.float32) * 0.1
    w2 = jax.random.normal(kw2, (dim2, dim2), dtype=jnp.float32) * 0.1
    b2 = jax.random.normal(kb2, (dim2,), dtype=jnp.float32) * 0.1

    ref = gcn_reference(x, w1, b1, w2, b2)

    # f32 path (matches PyTorch numerics; no wrapper-side dtype cast).
    out = jax.block_until_ready(gcn_forward(x, w1, b1, w2, b2))
    assert out.shape == (B, dim1, dim2)
    assert jnp.allclose(out, ref, atol=1e-4, rtol=1e-4), "f32 mismatch vs reference"

    # bf16 path: only used when x *arrives* in bf16 (no extra HBM cast pass);
    # resident weights follow x.dtype, MXU accumulation stays f32.
    x_bf16 = x.astype(jnp.bfloat16)
    out_bf16 = jax.block_until_ready(gcn_forward(x_bf16, w1, b1, w2, b2))
    assert out_bf16.shape == (B, dim1, dim2)
    assert jnp.allclose(out_bf16.astype(jnp.float32), ref, atol=1.5e-1, rtol=1.5e-1), \
        "bf16 mismatch vs reference"

    print("KERNEL_OK")
</pallas_src>

<mosaic_0001>
module attributes {stable_mosaic.version = 11 : i64} {
  func.func @gcn_kernel(%arg0: i32, %arg1: memref<8x128xf32, #tpu.memory_space<vmem>>, %arg2: memref<128x128xf32, #tpu.memory_space<vmem>>, %arg3: memref<8x8x1xf32, #tpu.memory_space<vmem>>, %arg4: memref<8x128xf32, #tpu.memory_space<vmem>>, %arg5: memref<8x128xf32, #tpu.memory_space<vmem>>) attributes {dimension_semantics = [#tpu.dimension_semantics<parallel>], iteration_bounds = array<i64: 2>, scalar_prefetch = 0 : i64, scratch_operands = 0 : i64, tpu.core_type = #tpu.core_type<tc>, window_params = [{transform_indices = @transform_0, window_bounds = array<i64: 8, 128>}, {pipeline_mode = #tpu.pipeline_mode<synchronous>, transform_indices = @transform_1, window_bounds = array<i64: 128, 128>}, {pipeline_mode = #tpu.pipeline_mode<synchronous>, transform_indices = @transform_2, window_bounds = array<i64: 8, 8, 1>}, {pipeline_mode = #tpu.pipeline_mode<synchronous>, transform_indices = @transform_3, window_bounds = array<i64: 8, 128>}, {transform_indices = @transform_4, window_bounds = array<i64: 8, 128>}]} {
    %c0 = arith.constant 0 : index
    %c0_0 = arith.constant 0 : index
    %0 = vector.load %arg1[%c0, %c0_0] : memref<8x128xf32, #tpu.memory_space<vmem>>, vector<8x128xf32>
    %c0_1 = arith.constant 0 : index
    %c0_2 = arith.constant 0 : index
    %1 = vector.load %arg2[%c0_1, %c0_2] : memref<128x128xf32, #tpu.memory_space<vmem>>, vector<128x128xf32>
    %cst = arith.constant dense<0.000000e+00> : vector<8x128xf32>
    %2 = tpu.matmul %0, %1, %cst {dimension_numbers = #tpu.dot_dimension_numbers<[1], [0], [0], [1], [0, 0, 1, 1], [], []>} : vector<8x128xf32>, vector<128x128xf32>, vector<8x128xf32> -> vector<8x128xf32>
    %3 = vector.shape_cast %2 : vector<8x128xf32> to vector<1x8x128xf32>
    %c0_3 = arith.constant 0 : index
    %c0_4 = arith.constant 0 : index
    %c0_5 = arith.constant 0 : index
    %4 = vector.load %arg3[%c0_3, %c0_4, %c0_5] : memref<8x8x1xf32, #tpu.memory_space<vmem>>, vector<1x8x1xf32>
    %5 = vector.shape_cast %4 : vector<1x8x1xf32> to vector<8x1xf32>
    %6 = vector.shape_cast %5 : vector<8x1xf32> to vector<1x8x1xf32>
    %7 = vector.extract_strided_slice %3 {offsets = [0, 0, 0], sizes = [1, 1, 128], strides = [1, 1, 1]} : vector<1x8x128xf32> to vector<1x1x128xf32>
    %8 = vector.broadcast %6 : vector<1x8x1xf32> to vector<1x8x128xf32>
    %9 = vector.broadcast %7 : vector<1x1x128xf32> to vector<1x8x128xf32>
    %10 = arith.mulf %8, %9 : vector<1x8x128xf32>
    %c1 = arith.constant 1 : index
    %c0_6 = arith.constant 0 : index
    %c0_7 = arith.constant 0 : index
    %11 = vector.load %arg3[%c1, %c0_6, %c0_7] : memref<8x8x1xf32, #tpu.memory_space<vmem>>, vector<1x8x1xf32>
    %12 = vector.shape_cast %11 : vector<1x8x1xf32> to vector<8x1xf32>
    %13 = vector.shape_cast %12 : vector<8x1xf32> to vector<1x8x1xf32>
    %14 = vector.extract_strided_slice %3 {offsets = [0, 1, 0], sizes = [1, 1, 128], strides = [1, 1, 1]} : vector<1x8x128xf32> to vector<1x1x128xf32>
    %15 = vector.broadcast %13 : vector<1x8x1xf32> to vector<1x8x128xf32>
    %16 = vector.broadcast %14 : vector<1x1x128xf32> to vector<1x8x128xf32>
    %17 = arith.mulf %15, %16 : vector<1x8x128xf32>
    %18 = arith.addf %10, %17 : vector<1x8x128xf32>
    %c2 = arith.constant 2 : index
    %c0_8 = arith.constant 0 : index
    %c0_9 = arith.constant 0 : index
    %19 = vector.load %arg3[%c2, %c0_8, %c0_9] : memref<8x8x1xf32, #tpu.memory_space<vmem>>, vector<1x8x1xf32>
    %20 = vector.shape_cast %19 : vector<1x8x1xf32> to vector<8x1xf32>
    %21 = vector.shape_cast %20 : vector<8x1xf32> to vector<1x8x1xf32>
    %22 = vector.extract_strided_slice %3 {offsets = [0, 2, 0], sizes = [1, 1, 128], strides = [1, 1, 1]} : vector<1x8x128xf32> to vector<1x1x128xf32>
    %23 = vector.broadcast %21 : vector<1x8x1xf32> to vector<1x8x128xf32>
    %24 = vector.broadcast %22 : vector<1x1x128xf32> to vector<1x8x128xf32>
    %25 = arith.mulf %23, %24 : vector<1x8x128xf32>
    %26 = arith.addf %18, %25 : vector<1x8x128xf32>
    %c3 = arith.constant 3 : index
    %c0_10 = arith.constant 0 : index
    %c0_11 = arith.constant 0 : index
    %27 = vector.load %arg3[%c3, %c0_10, %c0_11] : memref<8x8x1xf32, #tpu.memory_space<vmem>>, vector<1x8x1xf32>
    %28 = vector.shape_cast %27 : vector<1x8x1xf32> to vector<8x1xf32>
    %29 = vector.shape_cast %28 : vector<8x1xf32> to vector<1x8x1xf32>
    %30 = vector.extract_strided_slice %3 {offsets = [0, 3, 0], sizes = [1, 1, 128], strides = [1, 1, 1]} : vector<1x8x128xf32> to vector<1x1x128xf32>
    %31 = vector.broadcast %29 : vector<1x8x1xf32> to vector<1x8x128xf32>
    %32 = vector.broadcast %30 : vector<1x1x128xf32> to vector<1x8x128xf32>
    %33 = arith.mulf %31, %32 : vector<1x8x128xf32>
    %34 = arith.addf %26, %33 : vector<1x8x128xf32>
    %c4 = arith.constant 4 : index
    %c0_12 = arith.constant 0 : index
    %c0_13 = arith.constant 0 : index
    %35 = vector.load %arg3[%c4, %c0_12, %c0_13] : memref<8x8x1xf32, #tpu.memory_space<vmem>>, vector<1x8x1xf32>
    %36 = vector.shape_cast %35 : vector<1x8x1xf32> to vector<8x1xf32>
    %37 = vector.shape_cast %36 : vector<8x1xf32> to vector<1x8x1xf32>
    %38 = vector.extract_strided_slice %3 {offsets = [0, 4, 0], sizes = [1, 1, 128], strides = [1, 1, 1]} : vector<1x8x128xf32> to vector<1x1x128xf32>
    %39 = vector.broadcast %37 : vector<1x8x1xf32> to vector<1x8x128xf32>
    %40 = vector.broadcast %38 : vector<1x1x128xf32> to vector<1x8x128xf32>
    %41 = arith.mulf %39, %40 : vector<1x8x128xf32>
    %42 = arith.addf %34, %41 : vector<1x8x128xf32>
    %c5 = arith.constant 5 : index
    %c0_14 = arith.constant 0 : index
    %c0_15 = arith.constant 0 : index
    %43 = vector.load %arg3[%c5, %c0_14, %c0_15] : memref<8x8x1xf32, #tpu.memory_space<vmem>>, vector<1x8x1xf32>
    %44 = vector.shape_cast %43 : vector<1x8x1xf32> to vector<8x1xf32>
    %45 = vector.shape_cast %44 : vector<8x1xf32> to vector<1x8x1xf32>
    %46 = vector.extract_strided_slice %3 {offsets = [0, 5, 0], sizes = [1, 1, 128], strides = [1, 1, 1]} : vector<1x8x128xf32> to vector<1x1x128xf32>
    %47 = vector.broadcast %45 : vector<1x8x1xf32> to vector<1x8x128xf32>
    %48 = vector.broadcast %46 : vector<1x1x128xf32> to vector<1x8x128xf32>
    %49 = arith.mulf %47, %48 : vector<1x8x128xf32>
    %50 = arith.addf %42, %49 : vector<1x8x128xf32>
    %c6 = arith.constant 6 : index
    %c0_16 = arith.constant 0 : index
    %c0_17 = arith.constant 0 : index
    %51 = vector.load %arg3[%c6, %c0_16, %c0_17] : memref<8x8x1xf32, #tpu.memory_space<vmem>>, vector<1x8x1xf32>
    %52 = vector.shape_cast %51 : vector<1x8x1xf32> to vector<8x1xf32>
    %53 = vector.shape_cast %52 : vector<8x1xf32> to vector<1x8x1xf32>
    %54 = vector.extract_strided_slice %3 {offsets = [0, 6, 0], sizes = [1, 1, 128], strides = [1, 1, 1]} : vector<1x8x128xf32> to vector<1x1x128xf32>
    %55 = vector.broadcast %53 : vector<1x8x1xf32> to vector<1x8x128xf32>
    %56 = vector.broadcast %54 : vector<1x1x128xf32> to vector<1x8x128xf32>
    %57 = arith.mulf %55, %56 : vector<1x8x128xf32>
    %58 = arith.addf %50, %57 : vector<1x8x128xf32>
    %c7 = arith.constant 7 : index
    %c0_18 = arith.constant 0 : index
    %c0_19 = arith.constant 0 : index
    %59 = vector.load %arg3[%c7, %c0_18, %c0_19] : memref<8x8x1xf32, #tpu.memory_space<vmem>>, vector<1x8x1xf32>
    %60 = vector.shape_cast %59 : vector<1x8x1xf32> to vector<8x1xf32>
    %61 = vector.shape_cast %60 : vector<8x1xf32> to vector<1x8x1xf32>
    %62 = vector.extract_strided_slice %3 {offsets = [0, 7, 0], sizes = [1, 1, 128], strides = [1, 1, 1]} : vector<1x8x128xf32> to vector<1x1x128xf32>
    %63 = vector.broadcast %61 : vector<1x8x1xf32> to vector<1x8x128xf32>
    %64 = vector.broadcast %62 : vector<1x1x128xf32> to vector<1x8x128xf32>
    %65 = arith.mulf %63, %64 : vector<1x8x128xf32>
    %66 = arith.addf %58, %65 : vector<1x8x128xf32>
    %c0_20 = arith.constant 0 : index
    %c0_21 = arith.constant 0 : index
    %67 = vector.load %arg4[%c0_20, %c0_21] : memref<8x128xf32, #tpu.memory_space<vmem>>, vector<8x128xf32>
    %68 = vector.shape_cast %67 : vector<8x128xf32> to vector<1x8x128xf32>
    %69 = arith.addf %66, %68 : vector<1x8x128xf32>
    %70 = vector.shape_cast %69 : vector<1x8x128xf32> to vector<8x128xf32>
    %c0_22 = arith.constant 0 : index
    %c0_23 = arith.constant 0 : index
    %71 = vector.load %arg5[%c0_22, %c0_23] : memref<8x128xf32, #tpu.memory_space<vmem>>, vector<8x128xf32>
    tpu.vector_store %arg5[%c0_22, %c0_23], %70 {strides = array<i32>} : memref<8x128xf32, #tpu.memory_space<vmem>>, vector<8x128xf32>,
    return
  }
  func.func @transform_0(%arg0: i32) -> (i32, i32) {
    %c0_i32 = arith.constant 0 : i32
    %c0_i32_0 = arith.constant 0 : i32
    return %arg0, %c0_i32 : i32, i32
  }
  func.func @transform_1(%arg0: i32) -> (i32, i32) {
    %c0_i32 = arith.constant 0 : i32
    %c0_i32_0 = arith.constant 0 : i32
    %c0_i32_1 = arith.constant 0 : i32
    return %c0_i32, %c0_i32_0 : i32, i32
  }
  func.func @transform_2(%arg0: i32) -> (i32, i32, i32) {
    %c0_i32 = arith.constant 0 : i32
    %c0_i32_0 = arith.constant 0 : i32
    %c0_i32_1 = arith.constant 0 : i32
    %c0_i32_2 = arith.constant 0 : i32
    return %c0_i32, %c0_i32_0, %c0_i32_1 : i32, i32, i32
  }
  func.func @transform_3(%arg0: i32) -> (i32, i32) {
    %c0_i32 = arith.constant 0 : i32
    %c0_i32_0 = arith.constant 0 : i32
    %c0_i32_1 = arith.constant 0 : i32
    return %c0_i32, %c0_i32_0 : i32, i32
  }
  func.func @transform_4(%arg0: i32) -> (i32, i32) {
    %c0_i32 = arith.constant 0 : i32
    %c0_i32_0 = arith.constant 0 : i32
    return %arg0, %c0_i32 : i32, i32
  }
}

</mosaic_0001>

<bundles_post_ra>
// kernel: tpu_custom_call.1
= control target key start
LH: loop header
LB: loop body
LE: loop exit
PB: predicated region body
PF: predicated region fallthrough
CT: control target
= control target key end

     0   :  { %9 = vsyncpa [#allocation3], 0  ;;  %s886_s0 = inlined_call_operand.vmem [shape: f32[16,128], index: 0, kind: input, shape index: {}]   ;;  %s887_s1 = inlined_call_operand.hbm [shape: f32[128,128], index: 1, kind: input, shape index: {}]   ;;  %s888_s2 = inlined_call_operand.vmem [shape: f32[8,8,1], index: 2, kind: input, shape index: {}]   ;;  %s889_s3 = inlined_call_operand.vmem [shape: f32[8,128], index: 3, kind: input, shape index: {}]   ;;  %s890_s4 = inlined_call_operand.hbm [shape: f32[16,128], index: 4, kind: output, shape index: {}]  }
   0x1   :  { %10 = vsyncpa [#allocation4], 0 }
   0x2   :  { %12 = vsyncpa [#allocation4 + $0x1], 0  ;;  %s737_s15 = smov 0   ;;  %s739_s16 = smov 0  }
   0x3   :  { %s741_s17 = smov 0   ;;  %s743_s18 = smov 0  }
   0x4 LB: > { %s758_s19 = sadd.s32 4294967295, %s703_s18   ;;  %s485_s20 = sadd.s32 4294967294, %s703_s18   ;;  %s703_s18 = sphi %s743_s18, %s898_s18   ;;  %s699_s17 = sphi %s741_s17, %s897_s17   ;;  %s695_s16 = sphi %s739_s16, %s896_s16   ;;  %s691_s15 = sphi %s737_s15, %s895_s15  }
   0x5   : > { %s762_s21 = sadd.s32 1, %s703_s18   ;;  %s114_s22 = sadd.s32 1, %s699_s17 }
   0x6   : > { %s111_s23 = ssub.s32 %s703_s18, %s762_s21  ;;  %p124_p0 = scmp.ne.s32.totalorder %s699_s17, %s695_s16 }
   0x7   : > { %p112_p1 = scmp.eq.s32.totalorder %s111_s23, 0  ;;  %p125_p2 = scmp.eq.s32.totalorder %s758_s19, 1 }
   0x8   : > { %p130_p3 = scmp.ne.s32.totalorder %s695_s16, %s691_s15  ;;  %p131_p4 = scmp.eq.s32.totalorder %s485_s20, 1 }
   0x9   : > { %s773_s24 = scalar_select %p112_p1, %s699_s17, %s114_s22  }
   0xa   : > { %p775_p5 = por %p125_p2, %p124_p0  ;;  %p779_p6 = por %p131_p4, %p130_p3 }
   0xb   : > { %p486_p7 = scmp.ge.s32.totalorder %s703_s18, 1  ;;  %p138_p8 = scmp.lt.s32.totalorder %s703_s18, 3 }
   0xc   : > { %s892_s26 = scalar_select %p779_p6, 1, 0 }
   0xd   : > { %p570_p9 = scmp.eq.s32.totalorder %s758_s19, 0  ;;  %p786_p10 = pnand %p486_p7, %p138_p8 }
   0xe   : > { %s705_s28 = smov [#allocation2]  }
   0xf   : > { %s150_s29 = sshll.u32 %s705_s28, 4  ;;  %p562_p11 = pneg %p786_p10  ;;  %s151_s29 = int_to_ptr.vmem [resolvable:$true] %s150_s29 }
  0x10   : > { %s624_s30 = scalar_lea.vmem %s151_s29, 2048  ;;  %p632_p3 = scmp.lt.s32.totalorder %s151_s29, %s151_s29 }
  0x11   : > { %p563_p12 = pnand %p570_p9, %p562_p11  ;;  %p625_p0 = scmp.ne.s32.totalorder %s151_s29, %s624_s30 }
  0x12   : > { %p633_p4 = scmp.lt.s32.totalorder %s624_s30, %s624_s30 }
  0x13   : > { %p615_p13 = pneg %p563_p12 }
  0x14   : > { %p634_p6 = por %p633_p4, %p632_p3 }
  0x15   : > { %p627_p1 = pnand %p625_p0, %p615_p13 }
  0x17   : > { %p628_p2 = pneg %p627_p1 }
  0x19   : > { %p635_p7 = pnand %p634_p6, %p628_p2 }
  0x1b   : > { %638 = shalt.err (!%p635_p7)
}
  0x1c   : > { %s706_s5 = smov 128   ;;  %s707_s6 = smov 8  }
  0x1d   : > { %565 = dma.hbm_to_vmem [thread:$0]  (!%p563_p12), %s887_s1, 2048, %s151_s29, [#allocation3], %s706_s5, %s706_s5, %s707_s6  }
  0x1e   : > { %179 = sbr.rel (%p786_p10) target bundleno = 296 (0x128), region = 36 }
  0x23   : > { %682 = dma.done.wait (%p570_p9), [#allocation3], 2048  }
  0x24   : > { %684 = vsyncadd (%p570_p9), [#allocation3], 4294965248  ;;  %v708_v0 = vmov 0.0   ;;  %vm709_vm0 = vmmov 0   ;;  %v710_v1 = vmov 0   ;;  %v224_v2 = vld [vmem:[#allocation2 + $0x78] sm:$0xff]  ;;  %v301_v27 = vlaneseq }
  0x25   : > { %521 = vmatprep.subr.mxu0 %v708_v0  ;;  %553 = vmatprep.mubr.msk.f32.mxu0 %vm709_vm0, %v708_v0  ;;  %v223_v3 = vld [vmem:[#allocation2 + $0x70] sm:$0xff]  ;;  %v222_v4 = vld [vmem:[#allocation2 + $0x68] sm:$0xff]  ;;  %v221_v5 = vld [vmem:[#allocation2 + $0x60] sm:$0xff]  ;;  %p204_p6 = scmp.lt.s32.totalorder %s758_s19, 1  ;;  %s201_s13 = sand.u32 1, %s695_s16  }
  0x26   : > { %611 = vset.pattern.permute.xlu0 %v710_v1  ;;  %612 = vset.pattern.permute.xlu1 %v710_v1  ;;  %v295_v6 = vld [vmem:[%s888_s2] sm:$0xff]  ;;  %v220_v7 = vld [vmem:[#allocation2 + $0x58] sm:$0xff]  ;;  %v494_v8 = vld [vmem:[%s888_s2 + $0x10] sm:$0xff]  ;;  %v302_v29 = vshrl.u32 %v301_v27, 7  ;;  %s491_s14 = sshll.u32 %s201_s13, 3  ;;  %s501_s23 = sshll.u32 %s758_s19, 7 }
  0x27   : > { %522 = vmatpush3.msra.mxu0 %v224_v2  ;;  %298 = vperm.xlu0 %611, %v295_v6   ;;  %v493_v9 = vld [vmem:[%s888_s2 + $0x8] sm:$0xff]  ;;  %v219_v10 = vld [vmem:[#allocation2 + $0x50] sm:$0xff]  ;;  %v495_v11 = vld [vmem:[%s888_s2 + $0x18] sm:$0xff]  ;;  %s205_s8 = scalar_select %p204_p6, %s758_s19, 1 }
  0x28   : > { %523 = vmatprep.subr.mxu0 %v708_v0  ;;  %323 = vperm.xlu1 %612, %v494_v8   ;;  %v218_v12 = vld [vmem:[#allocation2 + $0x48] sm:$0xff]  ;;  %v496_v13 = vld [vmem:[%s888_s2 + $0x20] sm:$0xff]  ;;  %v216_v16 = vld [vmem:[#allocation2 + $0x38] sm:$0xff]  ;;  %v303_v31 = vsub.s32 0, %v302_v29  ;;  %v315_v32 = vsub.s32 1, %v302_v29  ;;  %v328_v33 = vsub.s32 2, %v302_v29  ;;  %s412_s5 = scalar_lea.hbm %s890_s4, %s501_s23 }
  0x29   : > { %524 = vmatpush3.msra.mxu0 %v223_v3  ;;  %v217_v14 = vld [vmem:[#allocation2 + $0x40] sm:$0xff]  ;;  %v497_v15 = vld [vmem:[%s888_s2 + $0x28] sm:$0xff]  ;;  %v498_v17 = vld [vmem:[%s888_s2 + $0x30] sm:$0xff]  ;;  %s492_s9 = sshll.u32 %s205_s8, 3  ;;  %v341_v35 = vsub.s32 3, %v302_v29  ;;  %v354_v38 = vsub.s32 4, %v302_v29 }
  0x2a   : > { %525 = vmatprep.subr.mxu0 %v708_v0  ;;  %v215_v18 = vld [vmem:[#allocation2 + $0x30] sm:$0xff]  ;;  %v499_v19 = vld [vmem:[%s888_s2 + $0x38] sm:$0xff]  ;;  %v214_v20 = vld [vmem:[#allocation2 + $0x28] sm:$0xff]  ;;  %s207_s12 = scalar_lea.vmem %s886_s0, %s492_s9  ;;  %v367_v43 = vsub.s32 5, %v302_v29  ;;  %v380_v47 = vsub.s32 6, %v302_v29  ;;  %v393_v53 = vsub.s32 7, %v302_v29 }
  0x2b   : > { %526 = vmatpush3.msra.mxu0 %v222_v4  ;;  %310 = vperm.xlu0 %611, %v493_v9   ;;  %v213_v21 = vld [vmem:[#allocation2 + $0x20] sm:$0xff]  ;;  %v212_v22 = vld [vmem:[#allocation2 + $0x18] sm:$0xff]  ;;  %v211_v23 = vld [vmem:[#allocation2 + $0x10] sm:$0xff]  ;;  %s203_s27 = scalar_lea.vmem [#allocation5], %s491_s14  ;;  %s401_s6 = scalar_lea.sflag [#allocation4], %s201_s13 }
  0x2c   : > { %527 = vmatprep.subr.mxu0 %v708_v0  ;;  %336 = vperm.xlu1 %612, %v495_v11   ;;  %v210_v24 = vld [vmem:[#allocation2 + $0x8] sm:$0xff]  ;;  %v209_v25 = vld [vmem:[#allocation2] sm:$0xff]  ;;  %s414_s28 = sshll.u32 %s203_s27, 4  ;;  %s711_s8 = smov [#allocation5]   ;;  %s415_s28 = int_to_ptr.vmem [resolvable:$true] %s414_s28 }
  0x2d   : > { %528 = vmatpush3.msra.mxu0 %v221_v5  ;;  %v208_v26 = vld [vmem:[%s207_s12] sm:$0xff]  ;;  %s639_s7 = scalar_lea.vmem %s415_s28, 128  ;;  %s643_s9 = sshll.u32 %s711_s8, 4  ;;  %s644_s9 = int_to_ptr.vmem [resolvable:$false] %s643_s9 }
  0x2e   : > { %529 = vmatprep.subr.mxu0 %v708_v0  ;;  %v397_v5 = vld [vmem:[%s889_s3] sm:$0xff]  ;;  %p640_p8 = scmp.ne.s32.totalorder %s415_s28, %s639_s7  ;;  %s645_s19 = scalar_lea.vmem %s644_s9, 256 }
  0x2f   : > { %530 = vmatpush3.msra.mxu0 %v220_v7  ;;  %349 = vperm.xlu0 %611, %v496_v13   ;;  %p646_p11 = scmp.lt.s32.totalorder %s415_s28, %s644_s9  ;;  %p647_p12 = scmp.lt.s32.totalorder %s645_s19, %s639_s7 }
  0x30   : > { %531 = vmatprep.subr.mxu0 %v708_v0  ;;  %362 = vperm.xlu1 %612, %v497_v15   ;;  %p641_p9 = pnand %p640_p8, %p775_p5 }
  0x31   : > { %532 = vmatpush3.msra.mxu0 %v219_v10  ;;  %p648_p13 = por %p647_p12, %p646_p11 }
  0x32   : > { %533 = vmatprep.subr.mxu0 %v708_v0  ;;  %p642_p10 = pneg %p641_p9 }
  0x33   : > { %534 = vmatpush3.msra.mxu0 %v218_v12  ;;  %375 = vperm.xlu0 %611, %v498_v17  }
  0x34   : > { %535 = vmatprep.subr.mxu0 %v708_v0  ;;  %388 = vperm.xlu1 %612, %v499_v19   ;;  %p649_p0 = pnand %p648_p13, %p642_p10 }
  0x35   : > { %536 = vmatpush3.msra.mxu0 %v217_v14 }
  0x36   : > { %537 = vmatprep.subr.mxu0 %v708_v0 }
  0x37   : > { %538 = vmatpush3.msra.mxu0 %v216_v16 }
  0x38   : > { %539 = vmatprep.subr.mxu0 %v708_v0 }
  0x39   : > { %540 = vmatpush3.msra.mxu0 %v215_v18 }
  0x3a   : > { %541 = vmatprep.subr.mxu0 %v708_v0 }
  0x3b   : > { %542 = vmatpush3.msra.mxu0 %v214_v20 }
  0x3c   : > { %543 = vmatprep.subr.mxu0 %v708_v0 }
  0x3d   : > { %544 = vmatpush3.msra.mxu0 %v213_v21 }
  0x3e   : > { %545 = vmatprep.subr.mxu0 %v708_v0 }
  0x3f   : > { %546 = vmatpush3.msra.mxu0 %v212_v22 }
  0x40   : > { %547 = vmatprep.subr.mxu0 %v708_v0 }
  0x41   : > { %548 = vmatpush3.msra.mxu0 %v211_v23 }
  0x42   : > { %549 = vmatprep.subr.mxu0 %v708_v0 }
  0x43   : > { %550 = vmatpush3.msra.mxu0 %v210_v24 }
  0x44   : > { %551 = vmatprep.subr.mxu0 %v708_v0 }
  0x45   : > { %552 = vmatpush3.msra.mxu0 %v209_v25 }
  0x46   : > { %554 = vmatmul.mubr.f32.vlgmr.msra.gmra.mxu0 %v208_v26 }
  0xa2   : > { %v299_v28 = vpop.permute.xlu0 %298 }
  0xa3   : > { %v324_v30 = vpop.permute.xlu1 %323 }
  0xa6   : > { %v311_v34 = vpop.permute.xlu0 %310 }
  0xa7   : > { %v337_v36 = vpop.permute.xlu1 %336 }
  0xaa   : > { %v350_v51 = vpop.permute.xlu0 %349 }
  0xab   : > { %v363_v52 = vpop.permute.xlu1 %362 }
  0xae   : > { %v376_v63 = vpop.permute.xlu0 %375 }
  0xaf   : > { %v389_v0 = vpop.permute.xlu1 %388 }
 0x106   : > { %v291_v37 = vpop.f32.mrf.mxu0 }
 0x107   : > { %v304_v39 = vrot.slane %v291_v37, %v303_v31  ;;  %v316_v40 = vrot.slane %v291_v37, %v315_v32  ;;  %v329_v41 = vrot.slane %v291_v37, %v328_v33  ;;  %v342_v46 = vrot.slane %v291_v37, %v341_v35 }
 0x108   : > { %v555_v42 = vpop.f32.mrf.mxu0  ;;  %v355_v50 = vrot.slane %v291_v37, %v354_v38  ;;  %v368_v56 = vrot.slane %v291_v37, %v367_v43  ;;  %v381_v59 = vrot.slane %v291_v37, %v380_v47  ;;  %v394_v62 = vrot.slane %v291_v37, %v393_v53 }
 0x109   : > { %v305_v44 = vmul.f32 %v304_v39, %v299_v28  ;;  %v317_v45 = vmul.f32 %v316_v40, %v311_v34  ;;  %v330_v49 = vmul.f32 %v329_v41, %v324_v30  ;;  %v343_v55 = vmul.f32 %v342_v46, %v337_v36 }
 0x10a   : > { %v356_v58 = vmul.f32 %v355_v50, %v350_v51  ;;  %v369_v61 = vmul.f32 %v368_v56, %v363_v52  ;;  %v382_v2 = vmul.f32 %v381_v59, %v376_v63  ;;  %v395_v4 = vmul.f32 %v394_v62, %v389_v0 }
 0x10b   : > { %v318_v48 = vadd.f32 %v317_v45, %v305_v44 }
 0x10d   : > { %v331_v54 = vadd.f32 %v330_v49, %v318_v48 }
 0x10f   : > { %v344_v57 = vadd.f32 %v343_v55, %v331_v54 }
 0x111   : > { %v357_v60 = vadd.f32 %v356_v58, %v344_v57 }
 0x113   : > { %v370_v1 = vadd.f32 %v369_v61, %v357_v60 }
 0x115   : > { %v383_v3 = vadd.f32 %v382_v2, %v370_v1 }
 0x117   : > { %v396_v6 = vadd.f32 %v395_v4, %v383_v3 }
 0x119   : > { %v398_v7 = vadd.f32 %v397_v5, %v396_v6 }
 0x11b   : > { %399 = vst [vmem:[%s203_s27] sm:$0xff] %v398_v7 }
 0x11c   : > { %652 = shalt.err (!%p649_p0)
}
 0x11d   : > { %s653_s10 = scalar_lea.hbm %s412_s5, 128  ;;  %s657_s13 = scalar_lea.hbm %s890_s4, 256 }
 0x11e   : > { %p654_p1 = scmp.ne.s32.totalorder %s412_s5, %s653_s10  ;;  %p658_p4 = scmp.lt.s32.totalorder %s412_s5, %s890_s4 }
 0x11f   : > { %p659_p7 = scmp.lt.s32.totalorder %s657_s13, %s653_s10 }
 0x120   : > { %p655_p2 = pnand %p654_p1, %p775_p5 }
 0x121   : > { %p660_p6 = por %p659_p7, %p658_p4 }
 0x122   : > { %p656_p3 = pneg %p655_p2 }
 0x124   : > { %p661_p8 = pnand %p660_p6, %p656_p3 }
 0x126   : > { %664 = shalt.err (!%p661_p8)
}
 0x127   : > { %560 = dma.vmem_to_hbm [thread:$0]  (%p775_p5), %s415_s28, 128, %s412_s5, %s401_s6  }
 0x128 PF: > { %p572_p9 = scmp.ge.s32.totalorder %s703_s18, 2  ;;  %s426_s22 = sand.u32 1, %s691_s15  }
 0x129   : > { %p894_p10 = scmp.ne.s32.totalorder %s892_s26, 0  ;;  %s427_s23 = scalar_lea.sflag [#allocation4], %s426_s22 }
 0x12b   : > { %p567_p11 = pnand %p572_p9, %p894_p10 }
 0x12d   : > { %p568_p12 = pneg %p567_p11 }
 0x12f   : > { %686 = dma.done.wait (%p568_p12), %s427_s23, 128  }
 0x130   : > { %688 = vsyncadd (%p568_p12), %s427_s23, 4294967168  ;;  %p15_p13 = scmp.ge.s32.totalorder %s762_s21, 4   ;;  %s895_s15 = smov %s695_s16 }
 0x131   : > { %s896_s16 = smov %s699_s17  ;;  %s897_s17 = smov %s773_s24 }
 0x132   : > { %s898_s18 = smov %s762_s21  ;;  %17 = sbr.rel (!%p15_p13) target bundleno = 4 (0x4), region = 83 }
 0x137   :  { %432 = vsyncpa [#allocation3], 1 }
 0x138   :  { %434 = vsyncpa [#allocation3 + $0x1], 1 }
 0x139   :  { %435 = vsyncpa [#allocation4], 1 }
 0x13a   :  { %437 = vsyncpa [#allocation4 + $0x1], 1 }

</bundles_post_ra>
